<compile_context>
chip_gen: v6e
topology: v6e:2x2x1
jax: 0.10.0
libtpu: 0.0.40
codegen_flags: <defaults>
</compile_context>

<pallas_src>
import math

import numpy as np
import jax
import jax.numpy as jnp
from jax.experimental import pallas as pl
from jax.experimental.pallas import tpu as pltpu


def make_pe_table(d_model: int, max_len: int) -> jnp.ndarray:
    """Deterministic parameter setup (plain JAX glue): sinusoidal PE table."""
    position = jnp.arange(max_len, dtype=jnp.float32)[:, None]            # (max_len, 1)
    div_term = jnp.exp(
        jnp.arange(0, d_model, 2, dtype=jnp.float32) * (-math.log(10000.0) / d_model)
    )                                                                     # (d_model//2,)
    args = position * div_term                                            # (max_len, d_model//2)
    pe = jnp.zeros((max_len, d_model), dtype=jnp.float32)
    pe = pe.at[:, 0::2].set(jnp.sin(args))
    pe = pe.at[:, 1::2].set(jnp.cos(args))
    return pe


def _round_up(a: int, b: int) -> int:
    return ((a + b - 1) // b) * b


def _vmem_capacity_bytes() -> int:
    """Generation-aware VMEM capacity; conservative fallback if query fails."""
    try:
        return int(pltpu.get_tpu_info().vmem_capacity_bytes)
    except Exception:
        return 64 * 1024 * 1024  # v7x per-TensorCore VMEM: safe on all generations


def _make_gather_kernel(tile_n: int, d_pad: int):
    """General gather: 8-row groups -> one sublane/lane-dense store per group."""
    groups = tile_n // 8

    def kernel(idx_ref, pe_ref, o_ref):
        # idx_ref: (n_pad,) int32, whole array resident in SMEM.
        # pe_ref : (max_len, d_pad) f32 PE table, VMEM-resident (constant block index).
        # o_ref  : (tile_n, d_pad) output tile for this grid step.
        base = pl.program_id(0) * tile_n

        @pl.loop(0, groups)
        def _(g):
            # Static inner group of 8: eight single-sublane loads ...
            rows = [
                pe_ref[pl.ds(idx_ref[base + g * 8 + r], 1), :]      # (1, d_pad)
                for r in range(8)
            ]
            block = jnp.concatenate(rows, axis=0)                   # (8, d_pad)
            # ... one dense 8-sublane, 128*k-lane store.
            off = pl.multiple_of(g * 8, 8)
            o_ref[pl.ds(off, 8), :] = block

    return kernel


def _make_contig_kernel(tile_n: int, start: int):
    """Fast path: indices are start + arange(n) -> plain dense block copy."""
    def kernel(pe_ref, o_ref):
        base = start + pl.program_id(0) * tile_n
        o_ref[...] = pe_ref[pl.ds(base, tile_n), :]
    return kernel


def positional_encoding_lookup(pe: jnp.ndarray, x: jnp.ndarray,
                               tile_n: int = 1024) -> jnp.ndarray:
    """Pallas kernel wrapper: returns pe[x], shape x.shape + (d_model,)."""
    max_len, d_model = pe.shape
    itemsize = jnp.dtype(pe.dtype).itemsize

    # ---- index preparation (plain JAX glue) --------------------------------
    idx = jnp.asarray(x).reshape(-1).astype(jnp.int32)
    n = int(idx.shape[0])
    idx = jnp.where(idx < 0, idx + max_len, idx)   # torch negative-index wrap
    idx = jnp.clip(idx, 0, max_len - 1)            # never OOB-read VMEM

    # ---- lane-dense layout: pad feature dim to a multiple of 128 -----------
    d_pad = _round_up(max(d_model, 1), 128)
    pe_pad = pe if d_pad == d_model else jnp.pad(pe, ((0, 0), (0, d_pad - d_model)))

    # ---- tiling, bounded by VMEM remaining after the resident table --------
    cap = _vmem_capacity_bytes() - (8 << 20)                 # leave Mosaic headroom
    table_bytes = 2 * max_len * d_pad * itemsize             # table is double-buffered
    tile_n = max(8, min(tile_n, _round_up(n, 8)))
    tile_n = _round_up(tile_n, 8)
    avail_out = max(cap - table_bytes - (2 << 20), 2 * 8 * d_pad * itemsize)
    max_tile = max(8, (avail_out // (2 * d_pad * itemsize)) // 8 * 8)
    tile_n = min(tile_n, max_tile)

    n_pad = _round_up(n, tile_n)
    if n_pad != n:
        idx = jnp.pad(idx, (0, n_pad - n))   # padded slots gather row 0; dropped below
    grid = (n_pad // tile_n,)

    def vmem_limit(table_rows: int) -> int:
        needed = (2 * table_rows * d_pad + 2 * tile_n * d_pad) * itemsize + (2 << 20)
        return int(min(max(needed, 16 << 20), max(cap, 16 << 20)))

    # ---- contiguous-index fast path (typical call: pe[arange(seq_len)]) ----
    fast, start = False, 0
    if n > 0 and tile_n <= max_len:
        try:  # only possible when indices are concrete (not under jit tracing)
            idx_np = np.asarray(idx[:n])
            start = int(idx_np[0])
            fast = bool(np.array_equal(idx_np, start + np.arange(n)))
        except Exception:
            fast = False

    if fast:
        # Pad the table by the few rows the last (ragged) tile may over-read,
        # so every dense block copy stays in bounds; padded rows are discarded.
        table_pad = max(0, start + n_pad - max_len)
        pe_src = pe_pad if table_pad == 0 else jnp.pad(pe_pad, ((0, table_pad), (0, 0)))
        rows_total = max_len + table_pad
        out = pl.pallas_call(
            _make_contig_kernel(tile_n, start),
            out_shape=jax.ShapeDtypeStruct((n_pad, d_pad), pe_pad.dtype),
            grid=grid,
            in_specs=[pl.BlockSpec((rows_total, d_pad), lambda i: (0, 0))],
            out_specs=pl.BlockSpec((tile_n, d_pad), lambda i: (i, 0)),
            compiler_params=pltpu.CompilerParams(
                dimension_semantics=("parallel",),
                vmem_limit_bytes=vmem_limit(rows_total),
            ),
        )(pe_src)
        return out[:n, :d_model].reshape(x.shape + (d_model,))

    # ---- general gather path ------------------------------------------------
    out = pl.pallas_call(
        _make_gather_kernel(tile_n, d_pad),
        out_shape=jax.ShapeDtypeStruct((n_pad, d_pad), pe_pad.dtype),
        grid=grid,
        in_specs=[
            # Flattened indices: whole array in SMEM (cheap scalar reads).
            pl.BlockSpec(memory_space=pltpu.MemorySpace.SMEM),
            # Full PE table, constant block index -> resident in VMEM.
            pl.BlockSpec((max_len, d_pad), lambda i: (0, 0)),
        ],
        out_specs=pl.BlockSpec((tile_n, d_pad), lambda i: (i, 0)),
        compiler_params=pltpu.CompilerParams(
            dimension_semantics=("parallel",),    # disjoint output tiles (2 TCs on v7x)
            vmem_limit_bytes=vmem_limit(max_len),
        ),
    )(idx, pe_pad)

    return out[:n, :d_model].reshape(x.shape + (d_model,))


if __name__ == "__main__":
    d_model = 32
    max_len = 64          # small stand-in for the default max_len=5000
    batch, seq = 2, 8

    pe = make_pe_table(d_model, max_len)
    key = jax.random.PRNGKey(0)

    # General (random-index) gather path.
    x = jax.random.randint(key, (batch, seq), minval=0, maxval=max_len, dtype=jnp.int32)
    out = jax.block_until_ready(positional_encoding_lookup(pe, x))
    ref = pe[x]
    assert out.shape == (batch, seq, d_model)
    assert jnp.allclose(out, ref), "Pallas gather mismatch vs reference"

    # Contiguous fast path (the typical PositionalEncoding call pattern).
    x2 = jnp.arange(seq, dtype=jnp.int32)
    out2 = jax.block_until_ready(positional_encoding_lookup(pe, x2))
    ref2 = pe[x2]
    assert out2.shape == (seq, d_model)
    assert jnp.allclose(out2, ref2), "Pallas contiguous fast-path mismatch vs reference"

    print("KERNEL_OK")
</pallas_src>

<mosaic_0001>
module attributes {stable_mosaic.version = 11 : i64} {
  func.func @kernel(%arg0: i32, %arg1: memref<16xi32, #tpu.memory_space<smem>>, %arg2: memref<64x128xf32, #tpu.memory_space<vmem>>, %arg3: memref<16x128xf32, #tpu.memory_space<vmem>>) attributes {dimension_semantics = [#tpu.dimension_semantics<parallel>], iteration_bounds = array<i64: 1>, scalar_prefetch = 0 : i64, scratch_operands = 0 : i64, tpu.core_type = #tpu.core_type<tc>, window_params = [{transform_indices = @transform_0, window_bounds = array<i64: 16>}, {pipeline_mode = #tpu.pipeline_mode<synchronous>, transform_indices = @transform_1, window_bounds = array<i64: 64, 128>}, {transform_indices = @transform_2, window_bounds = array<i64: 16, 128>}]} {
    %c16_i32 = arith.constant 16 : i32
    %0 = arith.muli %arg0, %c16_i32 : i32
    %c0_i32 = arith.constant 0 : i32
    %c2_i32 = arith.constant 2 : i32
    %1 = arith.addi %c0_i32, %c2_i32 : i32
    %c1_i32 = arith.constant 1 : i32
    scf.for %arg4 = %c0_i32 to %1 step %c1_i32  : i32 {
      %c1_i32_1 = arith.constant 1 : i32
      %2 = arith.muli %arg4, %c1_i32_1 : i32
      %c0_i32_2 = arith.constant 0 : i32
      %3 = arith.addi %c0_i32_2, %2 : i32
      %c8_i32 = arith.constant 8 : i32
      %4 = arith.muli %3, %c8_i32 : i32
      %5 = arith.addi %0, %4 : i32
      %c0_i32_3 = arith.constant 0 : i32
      %6 = arith.addi %5, %c0_i32_3 : i32
      %7 = arith.index_cast %6 : i32 to index
      %8 = memref.load %arg1[%7] : memref<16xi32, #tpu.memory_space<smem>>
      %9 = arith.index_cast %8 : i32 to index
      %c0 = arith.constant 0 : index
      %10 = vector.load %arg2[%9, %c0] : memref<64x128xf32, #tpu.memory_space<vmem>>, vector<1x128xf32>
      %c8_i32_4 = arith.constant 8 : i32
      %11 = arith.muli %3, %c8_i32_4 : i32
      %12 = arith.addi %0, %11 : i32
      %c1_i32_5 = arith.constant 1 : i32
      %13 = arith.addi %12, %c1_i32_5 : i32
      %14 = arith.index_cast %13 : i32 to index
      %15 = memref.load %arg1[%14] : memref<16xi32, #tpu.memory_space<smem>>
      %16 = arith.index_cast %15 : i32 to index
      %c0_6 = arith.constant 0 : index
      %17 = vector.load %arg2[%16, %c0_6] : memref<64x128xf32, #tpu.memory_space<vmem>>, vector<1x128xf32>
      %c8_i32_7 = arith.constant 8 : i32
      %18 = arith.muli %3, %c8_i32_7 : i32
      %19 = arith.addi %0, %18 : i32
      %c2_i32_8 = arith.constant 2 : i32
      %20 = arith.addi %19, %c2_i32_8 : i32
      %21 = arith.index_cast %20 : i32 to index
      %22 = memref.load %arg1[%21] : memref<16xi32, #tpu.memory_space<smem>>
      %23 = arith.index_cast %22 : i32 to index
      %c0_9 = arith.constant 0 : index
      %24 = vector.load %arg2[%23, %c0_9] : memref<64x128xf32, #tpu.memory_space<vmem>>, vector<1x128xf32>
      %c8_i32_10 = arith.constant 8 : i32
      %25 = arith.muli %3, %c8_i32_10 : i32
      %26 = arith.addi %0, %25 : i32
      %c3_i32 = arith.constant 3 : i32
      %27 = arith.addi %26, %c3_i32 : i32
      %28 = arith.index_cast %27 : i32 to index
      %29 = memref.load %arg1[%28] : memref<16xi32, #tpu.memory_space<smem>>
      %30 = arith.index_cast %29 : i32 to index
      %c0_11 = arith.constant 0 : index
      %31 = vector.load %arg2[%30, %c0_11] : memref<64x128xf32, #tpu.memory_space<vmem>>, vector<1x128xf32>
      %c8_i32_12 = arith.constant 8 : i32
      %32 = arith.muli %3, %c8_i32_12 : i32
      %33 = arith.addi %0, %32 : i32
      %c4_i32 = arith.constant 4 : i32
      %34 = arith.addi %33, %c4_i32 : i32
      %35 = arith.index_cast %34 : i32 to index
      %36 = memref.load %arg1[%35] : memref<16xi32, #tpu.memory_space<smem>>
      %37 = arith.index_cast %36 : i32 to index
      %c0_13 = arith.constant 0 : index
      %38 = vector.load %arg2[%37, %c0_13] : memref<64x128xf32, #tpu.memory_space<vmem>>, vector<1x128xf32>
      %c8_i32_14 = arith.constant 8 : i32
      %39 = arith.muli %3, %c8_i32_14 : i32
      %40 = arith.addi %0, %39 : i32
      %c5_i32 = arith.constant 5 : i32
      %41 = arith.addi %40, %c5_i32 : i32
      %42 = arith.index_cast %41 : i32 to index
      %43 = memref.load %arg1[%42] : memref<16xi32, #tpu.memory_space<smem>>
      %44 = arith.index_cast %43 : i32 to index
      %c0_15 = arith.constant 0 : index
      %45 = vector.load %arg2[%44, %c0_15] : memref<64x128xf32, #tpu.memory_space<vmem>>, vector<1x128xf32>
      %c8_i32_16 = arith.constant 8 : i32
      %46 = arith.muli %3, %c8_i32_16 : i32
      %47 = arith.addi %0, %46 : i32
      %c6_i32 = arith.constant 6 : i32
      %48 = arith.addi %47, %c6_i32 : i32
      %49 = arith.index_cast %48 : i32 to index
      %50 = memref.load %arg1[%49] : memref<16xi32, #tpu.memory_space<smem>>
      %51 = arith.index_cast %50 : i32 to index
      %c0_17 = arith.constant 0 : index
      %52 = vector.load %arg2[%51, %c0_17] : memref<64x128xf32, #tpu.memory_space<vmem>>, vector<1x128xf32>
      %c8_i32_18 = arith.constant 8 : i32
      %53 = arith.muli %3, %c8_i32_18 : i32
      %54 = arith.addi %0, %53 : i32
      %c7_i32 = arith.constant 7 : i32
      %55 = arith.addi %54, %c7_i32 : i32
      %56 = arith.index_cast %55 : i32 to index
      %57 = memref.load %arg1[%56] : memref<16xi32, #tpu.memory_space<smem>>
      %58 = arith.index_cast %57 : i32 to index
      %c0_19 = arith.constant 0 : index
      %59 = vector.load %arg2[%58, %c0_19] : memref<64x128xf32, #tpu.memory_space<vmem>>, vector<1x128xf32>
      %60 = tpu.concatenate %10, %17, %24, %31, %38, %45, %52, %59 in 0 : vector<1x128xf32>, vector<1x128xf32>, vector<1x128xf32>, vector<1x128xf32>, vector<1x128xf32>, vector<1x128xf32>, vector<1x128xf32>, vector<1x128xf32> -> vector<8x128xf32>
      %c8_i32_20 = arith.constant 8 : i32
      %61 = arith.muli %3, %c8_i32_20 : i32
      %62 = tpu.assume_multiple %61, 8 : i32
      %63 = arith.index_cast %62 : i32 to index
      %c0_21 = arith.constant 0 : index
      %64 = vector.load %arg3[%63, %c0_21] : memref<16x128xf32, #tpu.memory_space<vmem>>, vector<8x128xf32>
      tpu.vector_store %arg3[%63, %c0_21], %60 {strides = array<i32>} : memref<16x128xf32, #tpu.memory_space<vmem>>, vector<8x128xf32>,
    }
    %c2_i32_0 = arith.constant 2 : i32
    return
  }
  func.func @transform_0(%arg0: i32) -> i32 {
    %c0_i32 = arith.constant 0 : i32
    %c0_i32_0 = arith.constant 0 : i32
    return %c0_i32 : i32
  }
  func.func @transform_1(%arg0: i32) -> (i32, i32) {
    %c0_i32 = arith.constant 0 : i32
    %c0_i32_0 = arith.constant 0 : i32
    %c0_i32_1 = arith.constant 0 : i32
    return %c0_i32, %c0_i32_0 : i32, i32
  }
  func.func @transform_2(%arg0: i32) -> (i32, i32) {
    %c0_i32 = arith.constant 0 : i32
    %c0_i32_0 = arith.constant 0 : i32
    return %arg0, %c0_i32 : i32, i32
  }
}

</mosaic_0001>

<bundles_post_ra>
// kernel: tpu_custom_call.1
= control target key start
LH: loop header
LB: loop body
LE: loop exit
PB: predicated region body
PF: predicated region fallthrough
CT: control target
= control target key end

     0   :  { %7 = vsyncpa [#allocation5], 0  ;;  %s279_s0 = inlined_call_operand.hbm [shape: s32[16], index: 0, kind: input, shape index: {}]   ;;  %s280_s1 = inlined_call_operand.hbm [shape: f32[64,128], index: 1, kind: input, shape index: {}]   ;;  %s281_s2 = inlined_call_operand.hbm [shape: f32[16,128], index: 2, kind: output, shape index: {}]  }
   0x1   :  { %8 = vsyncpa [#allocation3], 0 }
   0x2   :  { %9 = vsyncpa [#allocation4], 0  ;;  %s223_s9 = smov [#allocation2]   ;;  %s224_s12 = smov [#allocation6]  }
   0x3   :  { %17 = dma.hbm_to_smem %s279_s0, 16, %s223_s9, [#allocation5]  }
   0x4   :  { %s23_s13 = sshll.u32 %s224_s12, 4  ;;  %s24_s13 = int_to_ptr.vmem [resolvable:$true] %s23_s13 }
   0x5   :  { %s177_s14 = scalar_lea.vmem %s24_s13, 1024  ;;  %p182_p1 = scmp.lt.s32.totalorder %s24_s13, %s24_s13 }
   0x6   :  { %p178_p0 = scmp.ne.s32.totalorder %s24_s13, %s177_s14  ;;  %p183_p2 = scmp.lt.s32.totalorder %s177_s14, %s177_s14 }
   0x8   :  { %p184_p3 = por %p183_p2, %p182_p1 }
   0xa   :  { %p185_p4 = pnand %p184_p3, %p178_p0 }
   0xc   :  { %188 = shalt.err (!%p185_p4)
}
   0xd   :  { %s225_s15 = smov 128   ;;  %s226_s16 = smov 8  }
   0xe   :  { %29 = dma.hbm_to_vmem [thread:$0]  %s280_s1, 1024, %s24_s13, [#allocation3], %s225_s15, %s225_s15, %s226_s16  }
   0xf   :  { %213 = dma.done.wait [#allocation5], 16  }
  0x10   :  { %214 = vsyncadd [#allocation5], 4294967280 }
  0x11   :  { %215 = dma.done.wait [#allocation3], 1024  }
  0x12   :  { %216 = vsyncadd [#allocation3], 4294966272 }
  0x13   :  { %36 = sfence }
  0x14   :  { %s252_s0 = smov 0  }
  0x15 LB: > { %s258_s19 = sshll.u32 %s221_s0, 3  ;;  %vm98_vm0 = vcmask 1040384   ;;  %vm100_vm1 = vcmask 1041408   ;;  %vm102_vm2 = vcmask 1042432   ;;  %vm104_vm3 = vcmask 1043456   ;;  %s43_s0 = sadd.s32 1, %s221_s0   ;;  %s221_s0 = sphi %s252_s0, %s43_s0  }
  0x16   : > { %s46_s1 = sld [smem:[#allocation2 + %s258_s19]]  ;;  %s49_s20 = sadd.s32 1, %s258_s19  ;;  %vm106_vm4 = vcmask 1044480   ;;  %vm108_vm5 = vcmask 1045504   ;;  %vm110_vm6 = vcmask 1046528  }
  0x17   : > { %s50_s21 = sld [smem:[#allocation2 + %s49_s20]]  ;;  %s53_s22 = sadd.s32 2, %s258_s19 }
  0x18   : > { %s54_s23 = sld [smem:[#allocation2 + %s53_s22]]  ;;  %s57_s24 = sadd.s32 3, %s258_s19 }
  0x19   : > { %s58_s25 = sld [smem:[#allocation2 + %s57_s24]]  ;;  %s61_s26 = sadd.s32 4, %s258_s19 }
  0x1a   : > { %s62_s27 = sld [smem:[#allocation2 + %s61_s26]]  ;;  %s65_s28 = sadd.s32 5, %s258_s19 }
  0x1b   : > { %s66_s29 = sld [smem:[#allocation2 + %s65_s28]]  ;;  %s69_s30 = sadd.s32 6, %s258_s19 }
  0x1c   : > { %s70_s3 = sld [smem:[#allocation2 + %s69_s30]]  ;;  %s73_s4 = sadd.s32 7, %s258_s19 }
  0x1d   : > { %s47_s5 = scalar_lea.vmem [#allocation6], %s46_s1  ;;  %s51_s6 = scalar_lea.vmem [#allocation6], %s50_s21 }
  0x1e   : > { %v48_v0 = vld [vmem:[%s47_s5] sm:$0x1]  ;;  %s74_s7 = sld [smem:[#allocation2 + %s73_s4]]  ;;  %s55_s8 = scalar_lea.vmem [#allocation6], %s54_s23 }
  0x1f   : > { %v52_v1 = vld [vmem:[%s51_s6] sm:$0x1]  ;;  %s59_s9 = scalar_lea.vmem [#allocation6], %s58_s25  ;;  %s112_s14 = scalar_lea.vmem [#allocation7], %s258_s19 }
  0x20   : > { %v56_v2 = vld [vmem:[%s55_s8] sm:$0x1]  ;;  %v78_v3 = vrot.slane %v52_v1, 7  ;;  %s63_s10 = scalar_lea.vmem [#allocation6], %s62_s27  ;;  %p40_p5 = scmp.ge.s32.totalorder %s43_s0, 2  }
  0x21   : > { %v60_v4 = vld [vmem:[%s59_s9] sm:$0x1]  ;;  %v81_v5 = vrot.slane %v56_v2, 6  ;;  %s67_s11 = scalar_lea.vmem [#allocation6], %s66_s29  ;;  %s227_s17 = smov (%p40_p5), [#allocation7]  }
  0x22   : > { %v64_v6 = vld [vmem:[%s63_s10] sm:$0x1]  ;;  %v84_v7 = vrot.slane %v60_v4, 5  ;;  %v99_v8 = vsel %vm98_vm0, %v48_v0, %v78_v3  ;;  %s71_s12 = scalar_lea.vmem [#allocation6], %s70_s3  ;;  %s119_s18 = sshll.u32 (%p40_p5), %s227_s17, 4  ;;  %s120_s18 = int_to_ptr.vmem [resolvable:$true] %s119_s18 }
  0x23   : > { %v68_v9 = vld [vmem:[%s67_s11] sm:$0x1]  ;;  %v87_v10 = vrot.slane %v64_v6, 4  ;;  %v101_v11 = vsel %vm100_vm1, %v99_v8, %v81_v5  ;;  %s189_s1 = scalar_lea.vmem (%p40_p5), %s120_s18, 256  ;;  %p194_p7 = scmp.lt.s32.totalorder (%p40_p5), %s120_s18, %s120_s18 }
  0x24   : > { %v72_v12 = vld [vmem:[%s71_s12] sm:$0x1]  ;;  %v90_v13 = vrot.slane %v68_v9, 3  ;;  %v103_v14 = vsel %vm102_vm2, %v101_v11, %v84_v7  ;;  %s75_s13 = scalar_lea.vmem [#allocation6], %s74_s7  ;;  %p190_p6 = scmp.ne.s32.totalorder (%p40_p5), %s120_s18, %s189_s1 }
  0x25   : > { %v93_v15 = vrot.slane %v72_v12, 2  ;;  %v105_v16 = vsel %vm104_vm3, %v103_v14, %v87_v10  ;;  %v76_v17 = vld [vmem:[%s75_s13] sm:$0x1]  ;;  %42 = sbr.rel (!%p40_p5) target bundleno = 21 (0x15), region = 52  ;;  %p195_p8 = scmp.lt.s32.totalorder (%p40_p5), %s189_s1, %s189_s1 }
  0x26   : > { %v107_v18 = vsel %vm106_vm4, %v105_v16, %v90_v13  ;;  %v96_v19 = vrot.slane %v76_v17, 1 }
  0x27   : > { %v109_v20 = vsel %vm108_vm5, %v107_v18, %v93_v15  ;;  %p196_p9 = por (%p40_p5), %p195_p8, %p194_p7 }
  0x28   : > { %v111_v21 = vsel %vm110_vm6, %v109_v20, %v96_v19 }
  0x29   : > { %113 = vst [vmem:[%s112_s14] sm:$0xff] %v111_v21  ;;  %p197_p10 = pnand (%p40_p5), %p196_p9, %p190_p6 }
  0x2b   :  { %200 = shalt.err (!%p197_p10)
}
  0x2c   :  { %125 = dma.vmem_to_hbm [thread:$0]  %s120_s18, 256, %s281_s2, [#allocation4], %s225_s15, %s225_s15, %s226_s16  }
  0x2d   :  { %217 = dma.done.wait [#allocation4], 256  }
  0x2e   :  { %218 = vsyncadd [#allocation4], 4294967040 }
  0x2f   :  { %129 = vsyncpa [#allocation3], 1 }
  0x30   :  { %130 = vsyncpa [#allocation4], 1 }
  0x31   :  { %131 = vsyncpa [#allocation5], 1 }

</bundles_post_ra>
